<compile_context>
chip_gen: v7x
topology: tpu7x:2x2x1
jax: 0.10.0
libtpu: 0.0.40
codegen_flags: <defaults>
</compile_context>

<pallas_src>
import functools

import jax
import jax.numpy as jnp
from jax.experimental import pallas as pl
from jax.experimental.pallas import tpu as pltpu

LANES = 128        # vreg lane width
SUBLANES_BF16 = 16  # bf16 vreg sublane packing


def _round_up(n, m):
    return ((n + m - 1) // m) * m


def _lstm_fc_kernel(x_ref, w_g_ref, b_g_ref, w_fc_ref, b_fc_ref, out_ref,
                    *, h_pad):
    """One batch tile: gate matmul -> single LSTM step -> fc1 -> sigmoid."""
    # Gate pre-activations on the MXU (bf16 operands, f32 accumulation).
    # Lane layout of the gate axis: [ i | o | g ], each h_pad (k*128) wide,
    # so every slice below is lane-aligned (no cross-lane data movement).
    gates = jnp.dot(x_ref[...], w_g_ref[...],
                    preferred_element_type=jnp.float32) + b_g_ref[...]

    sig = jax.nn.sigmoid(gates[:, :2 * h_pad])     # i and o in one EUP pass
    g_t = jnp.tanh(gates[:, 2 * h_pad:])           # g
    i_g = sig[:, :h_pad]
    o_g = sig[:, h_pad:]

    # seq_len == 1 with zero state: c1 = i*g (f-gate * c0 == 0), h1 = o*tanh(c1).
    c_1 = i_g * g_t
    h_1 = o_g * jnp.tanh(c_1)                      # (TB, h_pad) f32; pad lanes == 0

    # fc1 (output columns zero-padded to a full 128-lane width) + final sigmoid.
    logits = jnp.dot(h_1.astype(w_fc_ref.dtype), w_fc_ref[...],
                     preferred_element_type=jnp.float32) + b_fc_ref[...]
    out_ref[...] = jax.nn.sigmoid(logits).astype(out_ref.dtype)


def prepare_params(params):
    """One-time conversion of PyTorch-layout params to kernel layout.

    - keep only the live gates (i, g, o), transposed so contraction dim leads
    - fold b_ih + b_hh into a single bias row
    - pad each gate block and the fc output dim to full 128-lane widths
    - cast matmul operands to bf16 (MXU); keep biases in f32
    """
    w_ih, b_ih, b_hh, w_fc, b_fc = (params["w_ih"], params["b_ih"],
                                    params["b_hh"], params["w_fc"],
                                    params["b_fc"])
    # w_hh is intentionally unused: seq_len == 1 with zero initial state.
    H4, I = w_ih.shape
    H = H4 // 4
    C = w_fc.shape[0]
    H_pad = _round_up(H, LANES)
    C_pad = _round_up(C, LANES)

    bias = (b_ih + b_hh).astype(jnp.float32)       # (4H,)

    # PyTorch gate order in w_ih rows is [i, f, g, o]; kernel layout is [i, o, g].
    w_gates = jnp.zeros((I, 3 * H_pad), jnp.float32)
    b_gates = jnp.zeros((1, 3 * H_pad), jnp.float32)
    for slot, idx in enumerate((0, 3, 2)):         # i, o, g
        w_blk = w_ih[idx * H:(idx + 1) * H].astype(jnp.float32).T   # (I, H)
        b_blk = bias[idx * H:(idx + 1) * H]
        w_gates = w_gates.at[:, slot * H_pad:slot * H_pad + H].set(w_blk)
        b_gates = b_gates.at[0, slot * H_pad:slot * H_pad + H].set(b_blk)

    w_fc_t = jnp.zeros((H_pad, C_pad), jnp.float32).at[:H, :C].set(
        w_fc.astype(jnp.float32).T)
    b_fc_p = jnp.zeros((1, C_pad), jnp.float32).at[0, :C].set(
        b_fc.astype(jnp.float32))

    return {
        "w_gates_t": w_gates.astype(jnp.bfloat16),   # (I, 3*H_pad)
        "b_gates": b_gates,                          # (1, 3*H_pad) f32
        "w_fc_t": w_fc_t.astype(jnp.bfloat16),       # (H_pad, C_pad)
        "b_fc": b_fc_p,                              # (1, C_pad) f32
        "hidden": H, "h_pad": H_pad, "num_classes": C,
    }


def lstm_forward(x, prepared):
    """x: (B, input_size) f32 -> sigmoid(fc1(LSTM_step(x)))  (B, C) f32."""
    B, I = x.shape
    H_pad = prepared["h_pad"]
    C = prepared["num_classes"]
    w_g = prepared["w_gates_t"]
    b_g = prepared["b_gates"]
    w_fc = prepared["w_fc_t"]
    b_fc = prepared["b_fc"]
    G = w_g.shape[1]                 # 3 * H_pad
    C_pad = w_fc.shape[1]

    # Pad the batch to a bf16-sublane-aligned row tile and grid over rows.
    # The row axis is "parallel" so v7x's two TensorCores can split it; the
    # weights map to block (0, 0) on every grid step and stay VMEM-resident.
    TB = min(_round_up(B, SUBLANES_BF16), 256)
    B_pad = _round_up(B, TB)
    x_p = jnp.zeros((B_pad, I), jnp.bfloat16).at[:B].set(
        x.astype(jnp.bfloat16))

    kernel = functools.partial(_lstm_fc_kernel, h_pad=H_pad)

    out = pl.pallas_call(
        kernel,
        out_shape=jax.ShapeDtypeStruct((B_pad, C_pad), jnp.float32),
        grid=(B_pad // TB,),
        in_specs=[
            pl.BlockSpec((TB, I), lambda i: (i, 0)),        # x rows (streamed)
            pl.BlockSpec((I, G), lambda i: (0, 0)),         # gate weights (resident)
            pl.BlockSpec((1, G), lambda i: (0, 0)),         # folded LSTM bias
            pl.BlockSpec((H_pad, C_pad), lambda i: (0, 0)),  # W_fc^T (padded)
            pl.BlockSpec((1, C_pad), lambda i: (0, 0)),     # b_fc (padded)
        ],
        out_specs=pl.BlockSpec((TB, C_pad), lambda i: (i, 0)),
        compiler_params=pltpu.CompilerParams(
            dimension_semantics=("parallel",)),
    )(x_p, w_g, b_g, w_fc, b_fc)

    return out[:B, :C]


def init_params(key, input_size, hidden_size, num_classes):
    """Deterministic init mimicking PyTorch's U(-1/sqrt(H), 1/sqrt(H))."""
    ks = jax.random.split(key, 6)
    bound = 1.0 / jnp.sqrt(hidden_size)
    u = lambda k, shape: jax.random.uniform(
        k, shape, jnp.float32, minval=-bound, maxval=bound)
    return {
        "w_ih": u(ks[0], (4 * hidden_size, input_size)),
        "w_hh": u(ks[1], (4 * hidden_size, hidden_size)),
        "b_ih": u(ks[2], (4 * hidden_size,)),
        "b_hh": u(ks[3], (4 * hidden_size,)),
        "w_fc": u(ks[4], (num_classes, hidden_size)),
        "b_fc": u(ks[5], (num_classes,)),
    }


def reference_forward(x, params):
    """Plain-JAX f32 reference matching the PyTorch module."""
    H = params["w_hh"].shape[1]
    gates = x @ params["w_ih"].T + params["b_ih"] + params["b_hh"]
    i = jax.nn.sigmoid(gates[:, 0 * H:1 * H])
    g = jnp.tanh(gates[:, 2 * H:3 * H])
    o = jax.nn.sigmoid(gates[:, 3 * H:4 * H])
    h = o * jnp.tanh(i * g)                     # f-gate * c0 == 0
    return jax.nn.sigmoid(h @ params["w_fc"].T + params["b_fc"])


if __name__ == "__main__":
    B, INPUT, HIDDEN, CLASSES = 2, 16, 32, 8

    key = jax.random.PRNGKey(0)
    kx, kp = jax.random.split(key)
    x = jax.random.normal(kx, (B, INPUT), jnp.float32)
    params = init_params(kp, INPUT, HIDDEN, CLASSES)

    prepared = prepare_params(params)           # one-time weight prep
    out = lstm_forward(x, prepared)
    out = jax.block_until_ready(out)

    ref = reference_forward(x, params)
    assert out.shape == (B, CLASSES)
    # bf16 MXU operands vs f32 reference -> loose-but-meaningful tolerance.
    assert jnp.allclose(out, ref, atol=1e-2, rtol=1e-2), (
        jnp.max(jnp.abs(out - ref)))

    print("KERNEL_OK")
</pallas_src>

<mosaic_0001>
module attributes {stable_mosaic.version = 11 : i64} {
  func.func @_lstm_fc_kernel(%arg0: i32, %arg1: memref<16x16xbf16, #tpu.memory_space<vmem>>, %arg2: memref<16x384xbf16, #tpu.memory_space<vmem>>, %arg3: memref<1x384xf32, #tpu.memory_space<vmem>>, %arg4: memref<128x128xbf16, #tpu.memory_space<vmem>>, %arg5: memref<1x128xf32, #tpu.memory_space<vmem>>, %arg6: memref<16x128xf32, #tpu.memory_space<vmem>>) attributes {dimension_semantics = [#tpu.dimension_semantics<parallel>], iteration_bounds = array<i64: 1>, scalar_prefetch = 0 : i64, scratch_operands = 0 : i64, tpu.core_type = #tpu.core_type<tc>, window_params = [{transform_indices = @transform_0, window_bounds = array<i64: 16, 16>}, {pipeline_mode = #tpu.pipeline_mode<synchronous>, transform_indices = @transform_1, window_bounds = array<i64: 16, 384>}, {pipeline_mode = #tpu.pipeline_mode<synchronous>, transform_indices = @transform_2, window_bounds = array<i64: 1, 384>}, {pipeline_mode = #tpu.pipeline_mode<synchronous>, transform_indices = @transform_3, window_bounds = array<i64: 128, 128>}, {pipeline_mode = #tpu.pipeline_mode<synchronous>, transform_indices = @transform_4, window_bounds = array<i64: 1, 128>}, {transform_indices = @transform_5, window_bounds = array<i64: 16, 128>}]} {
    %c0 = arith.constant 0 : index
    %c0_0 = arith.constant 0 : index
    %0 = vector.load %arg1[%c0, %c0_0] : memref<16x16xbf16, #tpu.memory_space<vmem>>, vector<16x16xbf16>
    %c0_1 = arith.constant 0 : index
    %c0_2 = arith.constant 0 : index
    %1 = vector.load %arg2[%c0_1, %c0_2] : memref<16x384xbf16, #tpu.memory_space<vmem>>, vector<16x384xbf16>
    %cst = arith.constant dense<0.000000e+00> : vector<16x384xf32>
    %2 = tpu.matmul %0, %1, %cst {dimension_numbers = #tpu.dot_dimension_numbers<[1], [0], [0], [1], [0, 0, 1, 1], [], []>} : vector<16x16xbf16>, vector<16x384xbf16>, vector<16x384xf32> -> vector<16x384xf32>
    %c0_3 = arith.constant 0 : index
    %c0_4 = arith.constant 0 : index
    %3 = vector.load %arg3[%c0_3, %c0_4] : memref<1x384xf32, #tpu.memory_space<vmem>>, vector<1x384xf32>
    %4 = vector.broadcast %3 : vector<1x384xf32> to vector<16x384xf32>
    %5 = arith.addf %2, %4 : vector<16x384xf32>
    %6 = vector.extract_strided_slice %5 {offsets = [0, 0], sizes = [16, 256], strides = [1, 1]} : vector<16x384xf32> to vector<16x256xf32>
    %7 = arith.negf %6 : vector<16x256xf32>
    %8 = math.exp %7 : vector<16x256xf32>
    %cst_5 = arith.constant 1.000000e+00 : f32
    %9 = vector.broadcast %cst_5 : f32 to vector<16x256xf32>
    %10 = arith.addf %9, %8 : vector<16x256xf32>
    %11 = arith.divf %9, %10 : vector<16x256xf32>
    %12 = vector.extract_strided_slice %5 {offsets = [0, 256], sizes = [16, 128], strides = [1, 1]} : vector<16x384xf32> to vector<16x128xf32>
    %13 = math.tanh %12 : vector<16x128xf32>
    %14 = vector.extract_strided_slice %11 {offsets = [0, 0], sizes = [16, 128], strides = [1, 1]} : vector<16x256xf32> to vector<16x128xf32>
    %15 = vector.extract_strided_slice %11 {offsets = [0, 128], sizes = [16, 128], strides = [1, 1]} : vector<16x256xf32> to vector<16x128xf32>
    %16 = arith.mulf %14, %13 : vector<16x128xf32>
    %17 = math.tanh %16 : vector<16x128xf32>
    %18 = arith.mulf %15, %17 : vector<16x128xf32>
    %19 = arith.truncf %18 : vector<16x128xf32> to vector<16x128xbf16>
    %c0_6 = arith.constant 0 : index
    %c0_7 = arith.constant 0 : index
    %20 = vector.load %arg4[%c0_6, %c0_7] : memref<128x128xbf16, #tpu.memory_space<vmem>>, vector<128x128xbf16>
    %cst_8 = arith.constant dense<0.000000e+00> : vector<16x128xf32>
    %21 = tpu.matmul %19, %20, %cst_8 {dimension_numbers = #tpu.dot_dimension_numbers<[1], [0], [0], [1], [0, 0, 1, 1], [], []>} : vector<16x128xbf16>, vector<128x128xbf16>, vector<16x128xf32> -> vector<16x128xf32>
    %c0_9 = arith.constant 0 : index
    %c0_10 = arith.constant 0 : index
    %22 = vector.load %arg5[%c0_9, %c0_10] : memref<1x128xf32, #tpu.memory_space<vmem>>, vector<1x128xf32>
    %23 = vector.broadcast %22 : vector<1x128xf32> to vector<16x128xf32>
    %24 = arith.addf %21, %23 : vector<16x128xf32>
    %25 = arith.negf %24 : vector<16x128xf32>
    %26 = math.exp %25 : vector<16x128xf32>
    %cst_11 = arith.constant 1.000000e+00 : f32
    %27 = vector.broadcast %cst_11 : f32 to vector<16x128xf32>
    %28 = arith.addf %27, %26 : vector<16x128xf32>
    %29 = arith.divf %27, %28 : vector<16x128xf32>
    %c0_12 = arith.constant 0 : index
    %c0_13 = arith.constant 0 : index
    %30 = vector.load %arg6[%c0_12, %c0_13] : memref<16x128xf32, #tpu.memory_space<vmem>>, vector<16x128xf32>
    tpu.vector_store %arg6[%c0_12, %c0_13], %29 {strides = array<i32>} : memref<16x128xf32, #tpu.memory_space<vmem>>, vector<16x128xf32>,
    return
  }
  func.func @transform_0(%arg0: i32) -> (i32, i32) {
    %c0_i32 = arith.constant 0 : i32
    %c0_i32_0 = arith.constant 0 : i32
    return %arg0, %c0_i32 : i32, i32
  }
  func.func @transform_1(%arg0: i32) -> (i32, i32) {
    %c0_i32 = arith.constant 0 : i32
    %c0_i32_0 = arith.constant 0 : i32
    %c0_i32_1 = arith.constant 0 : i32
    return %c0_i32, %c0_i32_0 : i32, i32
  }
  func.func @transform_2(%arg0: i32) -> (i32, i32) {
    %c0_i32 = arith.constant 0 : i32
    %c0_i32_0 = arith.constant 0 : i32
    %c0_i32_1 = arith.constant 0 : i32
    return %c0_i32, %c0_i32_0 : i32, i32
  }
  func.func @transform_3(%arg0: i32) -> (i32, i32) {
    %c0_i32 = arith.constant 0 : i32
    %c0_i32_0 = arith.constant 0 : i32
    %c0_i32_1 = arith.constant 0 : i32
    return %c0_i32, %c0_i32_0 : i32, i32
  }
  func.func @transform_4(%arg0: i32) -> (i32, i32) {
    %c0_i32 = arith.constant 0 : i32
    %c0_i32_0 = arith.constant 0 : i32
    %c0_i32_1 = arith.constant 0 : i32
    return %c0_i32, %c0_i32_0 : i32, i32
  }
  func.func @transform_5(%arg0: i32) -> (i32, i32) {
    %c0_i32 = arith.constant 0 : i32
    %c0_i32_0 = arith.constant 0 : i32
    return %arg0, %c0_i32 : i32, i32
  }
}

</mosaic_0001>

<bundles_post_ra>
// kernel: tpu_custom_call.1
= control target key start
LH: loop header
LB: loop body
LE: loop exit
PB: predicated region body
PF: predicated region fallthrough
CT: control target
= control target key end

     0   :  { %10 = vsyncpa [#allocation3], 0  ;;  %s679_s0 = inlined_call_operand.hbm [shape: bf16[16,16], index: 0, kind: input, shape index: {}]   ;;  %s680_s1 = inlined_call_operand.hbm [shape: bf16[16,384], index: 1, kind: input, shape index: {}]   ;;  %s681_s2 = inlined_call_operand.vmem [shape: f32[1,384], index: 2, kind: input, shape index: {}]   ;;  %s682_s3 = inlined_call_operand.hbm [shape: bf16[128,128], index: 3, kind: input, shape index: {}]   ;;  %s683_s4 = inlined_call_operand.vmem [shape: f32[1,128], index: 4, kind: input, shape index: {}]   ;;  %s684_s5 = inlined_call_operand.hbm [shape: f32[16,128], index: 5, kind: output, shape index: {}]  }
   0x1   :  { %11 = vsyncpa [#allocation6], 0 }
   0x2   :  { %12 = vsyncpa [#allocation4], 0  ;;  %s582_s18 = smov [#allocation5]   ;;  %s488_s22 = scalar_lea.hbm %s680_s1, 384 }
   0x3   :  { %s30_s19 = sshll.u32 %s582_s18, 4  ;;  %p489_p0 = scmp.ne.s32.totalorder %s680_s1, %s488_s22  ;;  %s31_s19 = int_to_ptr.vmem [resolvable:$true] %s30_s19 }
   0x4   :  { %p492_p1 = scmp.lt.u32.totalorder %s488_s22, %s680_s1 }
   0x6   :  { %p494_p2 = pnand %p492_p1, %p489_p0 }
   0x8   :  { %497 = shalt.err (!%p494_p2)
}
   0x9   :  { %s498_s27 = scalar_lea.vmem %s31_s19, 384  ;;  %p503_p4 = scmp.lt.s32.totalorder %s31_s19, %s31_s19 }
   0xa   :  { %p499_p3 = scmp.ne.s32.totalorder %s31_s19, %s498_s27  ;;  %p504_p5 = scmp.lt.s32.totalorder %s498_s27, %s498_s27 }
   0xc   :  { %p505_p6 = por %p504_p5, %p503_p4 }
   0xe   :  { %p506_p7 = pnand %p505_p6, %p499_p3 }
  0x10   :  { %509 = shalt.err (!%p506_p7)
}
  0x11   :  { %s583_s28 = smov 192   ;;  %s584_s29 = smov 12  }
  0x12   :  { %36 = dma.hbm_to_vmem [thread:$0]  %s680_s1, 384, %s31_s19, [#allocation6], %s583_s28, %s583_s28, %s584_s29  }
  0x13   :  { %s585_s7 = smov [#allocation2]   ;;  %s510_s11 = scalar_lea.hbm %s679_s0, 128 }
  0x14   :  { %s18_s8 = sshll.u32 %s585_s7, 4  ;;  %p511_p8 = scmp.ne.s32.totalorder %s679_s0, %s510_s11  ;;  %s19_s8 = int_to_ptr.vmem [resolvable:$true] %s18_s8 }
  0x15   :  { %p514_p9 = scmp.lt.u32.totalorder %s510_s11, %s679_s0 }
  0x17   :  { %p516_p10 = pnand %p514_p9, %p511_p8 }
  0x19   :  { %519 = shalt.err (!%p516_p10)
}
  0x1a   :  { %s520_s16 = scalar_lea.vmem %s19_s8, 128  ;;  %p525_p12 = scmp.lt.s32.totalorder %s19_s8, %s19_s8 }
  0x1b   :  { %p521_p11 = scmp.ne.s32.totalorder %s19_s8, %s520_s16  ;;  %p526_p13 = scmp.lt.s32.totalorder %s520_s16, %s520_s16 }
  0x1d   :  { %p527_p0 = por %p526_p13, %p525_p12 }
  0x1f   :  { %p528_p1 = pnand %p527_p0, %p521_p11 }
  0x21   :  { %531 = shalt.err (!%p528_p1)
}
  0x22   :  { %s586_s1 = smov 64   ;;  %s587_s17 = smov 4  }
  0x23   :  { %24 = dma.hbm_to_vmem [thread:$0]  %s679_s0, 128, %s19_s8, [#allocation3], %s586_s1, %s586_s1, %s587_s17  }
  0x24   :  { %s588_s20 = smov [#allocation7]   ;;  %s532_s24 = scalar_lea.hbm %s682_s3, 1024 }
  0x25   :  { %s44_s21 = sshll.u32 %s588_s20, 4  ;;  %p533_p2 = scmp.ne.s32.totalorder %s682_s3, %s532_s24  ;;  %s45_s21 = int_to_ptr.vmem [resolvable:$true] %s44_s21 }
  0x26   :  { %p536_p3 = scmp.lt.u32.totalorder %s532_s24, %s682_s3 }
  0x28   :  { %p538_p4 = pnand %p536_p3, %p533_p2 }
  0x2a   :  { %541 = shalt.err (!%p538_p4)
}
  0x2b   :  { %s542_s29 = scalar_lea.vmem %s45_s21, 1024  ;;  %p547_p6 = scmp.lt.s32.totalorder %s45_s21, %s45_s21 }
  0x2c   :  { %p543_p5 = scmp.ne.s32.totalorder %s45_s21, %s542_s29  ;;  %p548_p7 = scmp.lt.s32.totalorder %s542_s29, %s542_s29 }
  0x2e   :  { %p549_p8 = por %p548_p7, %p547_p6 }
  0x30   :  { %p550_p9 = pnand %p549_p8, %p543_p5 }
  0x32   :  { %553 = shalt.err (!%p550_p9)
}
  0x33   :  { %50 = dma.hbm_to_vmem [thread:$0]  %s682_s3, 1024, %s45_s21, [#allocation6], %s586_s1, %s586_s1, %s587_s17  }
  0x34   :  { %576 = dma.done.wait [#allocation3], 128  }
  0x35   :  { %577 = vsyncadd [#allocation3], 4294967168 }
  0x36   :  { %578 = dma.done.wait [#allocation6], 1408  }
  0x37   :  { %579 = vsyncadd [#allocation6], 4294965888  ;;  %v589_v0 = vmov 0   ;;  %v590_v1 = vmov 0.0   ;;  %vm591_vm0 = vmmov 0   ;;  %v446_v4 = vld [vmem:[#allocation2] sm:$0xff]   ;;  %v71_v14 = vlaneseq }
  0x38   :  { %143 = vmatprep.mubr.bf16.mxu1 %v589_v0  ;;  %410 = vmatprep.subr.bf16.mxu0 %v590_v1  ;;  %v443_v2 = vld [vmem:[#allocation5 + $0x4] ss:$12 sps:$4 sm:$0xff]   ;;  %v445_v3 = vld [vmem:[#allocation5] ss:$12 sps:$4 sm:$0xff]   ;;  %vm107_vm1 = vcmask 130048   ;;  %v448_v6 = vld [vmem:[#allocation7] sm:$0xff]  }
  0x39   :  { %426 = vmatprep.mubr.msk.bf16.mxu0 %vm591_vm0, %v590_v1  ;;  %111 = vmatprep.subr.bf16.mxu1 %v443_v2  ;;  %v447_v5 = vld [vmem:[#allocation5 + $0x8] ss:$12 sps:$4 sm:$0xff]   ;;  %v449_v7 = vld [vmem:[#allocation7 + $0x8] sm:$0xff]   ;;  %v452_v10 = vld [vmem:[#allocation7 + $0x20] sm:$0xff]   ;;  %v72_v15 = vshrl.u32 %v71_v14, 7  ;;  %s592_s8 = smov [#allocation8]  }
  0x3a   :  { %112 = vmatpush1.bf16.msra.mxu1 %v445_v3  ;;  %411 = vmatpush3.bf16.msra.mxu0 %v448_v6  ;;  %v450_v8 = vld [vmem:[#allocation7 + $0x10] sm:$0xff]   ;;  %v451_v9 = vld [vmem:[#allocation7 + $0x18] sm:$0xff]   ;;  %v453_v11 = vld [vmem:[#allocation7 + $0x28] sm:$0xff]   ;;  %s359_s9 = sshll.u32 %s592_s8, 4  ;;  %s360_s9 = int_to_ptr.vmem [resolvable:$true] %s359_s9 }
  0x3b   :  { %404 = vmatprep.subr.bf16.mxu1 %v590_v1  ;;  %412 = vmatprep.subr.bf16.mxu0 %v590_v1  ;;  %v454_v12 = vld [vmem:[#allocation7 + $0x30] sm:$0xff]   ;;  %v455_v13 = vld [vmem:[#allocation7 + $0x38] sm:$0xff]   ;;  %v73_v16 = vsub.s32 0, %v72_v15  ;;  %v69_v17 = vld [vmem:[%s681_s2] sm:$0x7]  ;;  %v77_v19 = vsub.s32 1, %v72_v15  ;;  %p559_p11 = scmp.lt.s32.totalorder %s360_s9, %s360_s9 }
  0x3c   :  { %v81_v28 = vsub.s32 2, %v72_v15  ;;  %v382_v62 = vld [vmem:[%s683_s4] ss:$0 sm:$0xff]  ;;  %s554_s4 = scalar_lea.vmem %s360_s9, 256 }
  0x3d   :  { %376 = vmatmul.mubr.msk.bf16.vlgmr.msra.gmra.mrb[0].mxu1 %vm107_vm1, %v446_v4  ;;  %v74_v18 = vrot.slane %v69_v17, %v73_v16  ;;  %v78_v22 = vrot.slane %v69_v17, %v77_v19  ;;  %p555_p10 = scmp.ne.s32.totalorder %s360_s9, %s554_s4  ;;  %p560_p12 = scmp.lt.s32.totalorder %s554_s4, %s554_s4 }
  0x3e   :  { %405 = vmatpush3.bf16.msra.mxu1 %v447_v5  ;;  %406 = vmatprep.mubr.msk.bf16.mxu1 %vm591_vm0, %v590_v1  ;;  %v82_v32 = vrot.slane %v69_v17, %v81_v28 }
  0x3f   :  { %413 = vmatpush3.bf16.msra.mxu0 %v449_v7  ;;  %p561_p13 = por %p560_p12, %p559_p11 }
  0x40   :  { %414 = vmatprep.subr.bf16.mxu0 %v590_v1 }
  0x41   :  { %p562_p0 = pnand %p561_p13, %p555_p10 }
  0x43   :  { %415 = vmatpush3.bf16.msra.mxu0 %v450_v8 }
  0x44   :  { %416 = vmatprep.subr.bf16.mxu0 %v590_v1 }
  0x45   :  { %407 = vmatmul.mubr.msk.bf16.vlgmr.msra.gmra.mrb[4].mxu1 %vm107_vm1, %v446_v4 }
  0x47   :  { %417 = vmatpush3.bf16.msra.mxu0 %v451_v9 }
  0x48   :  { %418 = vmatprep.subr.bf16.mxu0 %v590_v1 }
  0x4b   :  { %419 = vmatpush3.bf16.msra.mxu0 %v452_v10 }
  0x4c   :  { %420 = vmatprep.subr.bf16.mxu0 %v590_v1 }
  0x4f   :  { %421 = vmatpush3.bf16.msra.mxu0 %v453_v11 }
  0x50   :  { %422 = vmatprep.subr.bf16.mxu0 %v590_v1 }
  0x53   :  { %423 = vmatpush3.bf16.msra.mxu0 %v454_v12 }
  0x54   :  { %424 = vmatprep.subr.bf16.mxu0 %v590_v1 }
  0x57   :  { %425 = vmatpush3.bf16.msra.mxu0 %v455_v13 }
 0x110   :  { %v145_v20 = vpop.f32.mrb[0].mxu1 }
 0x111   :  { %v146_v21 = vadd.f32 %v145_v20, %v74_v18  ;;  %v147_v23 = vpop.f32.mrb[1].mxu1 }
 0x112   :  { %v149_v24 = vpop.f32.mrb[2].mxu1  ;;  %v148_v29 = vadd.f32 %v147_v23, %v78_v22 }
 0x113   :  { %v378_v25 = vmul.f32 -1.442695, %v146_v21  ;;  %v150_v26 = vadd.f32 %v149_v24, %v74_v18  ;;  %v151_v27 = vpop.f32.mrb[3].mxu1 }
 0x114   :  { %v152_v31 = vadd.f32 %v151_v27, %v78_v22  ;;  %v379_v34 = vmul.f32 -1.442695, %v148_v29 }
 0x115   :  { %456 = vpow2.f32 %v378_v25  ;;  %v380_v30 = vmul.f32 -1.442695, %v150_v26 }
 0x116   :  { %v381_v37 = vmul.f32 -1.442695, %v152_v31 }
 0x117   :  { %458 = vpow2.f32 %v380_v30 }
 0x118   :  { %v188_v33 = vpop.f32.mrb[4].mxu1  ;;  %460 = vpow2.f32 %v379_v34 }
 0x119   :  { %v408_v35 = vpop.f32.mrb[5].mxu1  ;;  %v189_v39 = vadd.f32 %v188_v33, %v82_v32  ;;  %462 = vpow2.f32 %v381_v37 }
 0x11a   :  { %v191_v36 = vpop.f32.mrb[6].mxu1 }
 0x11b   :  { %v409_v38 = vpop.f32.mrb[7].mxu1  ;;  %v192_v41 = vadd.f32 %v191_v36, %v82_v32  ;;  %464 = vtanh.f32 %v189_v39 }
 0x11f   :  { %v457_v40 = vpop.eup %456 }
 0x120   :  { %v207_v42 = vadd.f32 1.0, %v457_v40 }
 0x121   :  { %v459_v43 = vpop.eup %458 }
 0x122   :  { %466 = vrcp.f32 %v207_v42  ;;  %v209_v44 = vadd.f32 1.0, %v459_v43  ;;  %v461_v45 = vpop.eup %460 }
 0x123   :  { %468 = vtanh.f32 %v192_v41  ;;  %v463_v46 = vpop.eup %462  ;;  %v208_v48 = vadd.f32 1.0, %v461_v45 }
 0x124   :  { %470 = vrcp.f32 %v209_v44  ;;  %v210_v50 = vadd.f32 1.0, %v463_v46 }
 0x125   :  { %v465_v47 = vpop.eup %464  ;;  %472 = vrcp.f32 %v208_v48 }
 0x12c   :  { %v467_v49 = vpop.eup %466 }
 0x12d   :  { %v469_v51 = vpop.eup %468  ;;  %v221_v52 = vmul.f32 %v467_v49, %v465_v47 }
 0x12e   :  { %v471_v53 = vpop.eup %470 }
 0x12f   :  { %474 = vtanh.f32 %v221_v52  ;;  %v222_v54 = vmul.f32 %v471_v53, %v469_v51  ;;  %v473_v55 = vpop.eup %472 }
 0x130   :  { %476 = vrcp.f32 %v210_v50 }
 0x131   :  { %478 = vtanh.f32 %v222_v54 }
 0x139   :  { %v475_v56 = vpop.eup %474 }
 0x13a   :  { %v477_v57 = vpop.eup %476  ;;  %v225_v58 = vmul.f32 %v475_v56, %v473_v55 }
 0x13b   :  { %v479_v59 = vpop.eup %478 }
 0x13c   :  { %v226_v60 = vmul.f32 %v479_v59, %v477_v57 }
 0x13e   :  { %v227_v61 = vpack.c.bf16 %v226_v60, %v225_v58 }
 0x140   :  { %427 = vmatmul.mubr.bf16.vlgmr.msra.gmra.mrb[0].mxu0 %v227_v61 }
 0x213   :  { %v333_v63 = vpop.f32.mrb[0].mxu0 }
 0x214   :  { %v334_v0 = vadd.f32 %v382_v62, %v333_v63  ;;  %v428_v1 = vpop.f32.mrb[1].mxu0 }
 0x215   :  { %v336_v2 = vpop.f32.mrb[2].mxu0 }
 0x216   :  { %v391_v3 = vmul.f32 -1.442695, %v334_v0  ;;  %v337_v4 = vadd.f32 %v382_v62, %v336_v2  ;;  %v429_v5 = vpop.f32.mrb[3].mxu0 }
 0x218   :  { %480 = vpow2.f32 %v391_v3  ;;  %v392_v6 = vmul.f32 -1.442695, %v337_v4 }
 0x21a   :  { %482 = vpow2.f32 %v392_v6 }
 0x222   :  { %v481_v7 = vpop.eup %480 }
 0x223   :  { %v346_v8 = vadd.f32 1.0, %v481_v7 }
 0x224   :  { %v483_v9 = vpop.eup %482 }
 0x225   :  { %484 = vrcp.f32 %v346_v8  ;;  %v347_v10 = vadd.f32 1.0, %v483_v9 }
 0x227   :  { %486 = vrcp.f32 %v347_v10 }
 0x22f   :  { %v485_v11 = vpop.eup %484 }
 0x230   :  { %352 = vst [vmem:[#allocation8] sm:$0xff] %v485_v11 }
 0x231   :  { %v487_v12 = vpop.eup %486 }
 0x232   :  { %353 = vst [vmem:[#allocation8 + $0x8] sm:$0xff] %v487_v12 }
 0x233   :  { %565 = shalt.err (!%p562_p0)
}
 0x234   :  { %s566_s12 = scalar_lea.hbm %s684_s5, 256 }
 0x235   :  { %p567_p1 = scmp.ne.s32.totalorder %s684_s5, %s566_s12  ;;  %p570_p2 = scmp.lt.u32.totalorder %s566_s12, %s684_s5 }
 0x237   :  { %p572_p3 = pnand %p570_p2, %p567_p1 }
 0x239   :  { %575 = shalt.err (!%p572_p3)
}
 0x23a   :  { %s593_s1 = smov 128   ;;  %s594_s17 = smov 8  }
 0x23b   :  { %365 = dma.vmem_to_hbm [thread:$0]  %s360_s9, 256, %s684_s5, [#allocation4], %s593_s1, %s593_s1, %s594_s17  }
 0x23c   :  { %580 = dma.done.wait [#allocation4], 256  }
 0x23d   :  { %581 = vsyncadd [#allocation4], 4294967040 }
 0x23e   :  { %369 = vsyncpa [#allocation3], 1 }
 0x23f   :  { %370 = vsyncpa [#allocation6], 1 }
 0x240   :  { %371 = vsyncpa [#allocation4], 1 }

</bundles_post_ra>
